<compile_context>
chip_gen: v7x
topology: tpu7x:2x2x1
jax: 0.10.0
libtpu: 0.0.40
codegen_flags: <defaults>
</compile_context>

<pallas_src>
import math

import jax
import jax.numpy as jnp
from jax.experimental import pallas as pl
from jax.experimental.pallas import tpu as pltpu


def _scaling_kernel(x_ref, scale_ref, bias_ref, o_ref):
    # x_ref: (tm, tf); scale_ref/bias_ref: (1, tf) f32 -> sublane broadcast on the VPU.
    x = x_ref[...].astype(jnp.float32)
    o_ref[...] = (scale_ref[...] * x + bias_ref[...]).astype(o_ref.dtype)


def _vmem_capacity_bytes():
    """Physical VMEM per core, with a safe fallback when no TPU is attached."""
    try:
        info = pltpu.get_tpu_info()
        cap = getattr(info, "vmem_capacity_bytes", None)
        if cap:
            return int(cap)
    except Exception:
        pass
    return 128 << 20


def learnable_scaling(x, scale, bias):
    """y = scale * x + bias, broadcasting scale/bias over all but the last axis."""
    orig_shape = x.shape
    F = orig_shape[-1]
    assert scale.shape == (F,) and bias.shape == (F,)

    x_dtype = x.dtype
    out_dtype = jnp.result_type(x_dtype, scale.dtype, bias.dtype)
    itemsize = max(jnp.dtype(x_dtype).itemsize, jnp.dtype(out_dtype).itemsize)

    # --- VMEM budget (generation-aware). 2 double-buffered tiles (in + out) of
    # target_tile_bytes each, plus headroom for scale/bias and Mosaic scratch.
    phys_vmem = _vmem_capacity_bytes()
    vmem_limit = min(phys_vmem * 3 // 4, 64 << 20)        # 48 MiB v7x, 64 MiB v5e/v6e
    headroom = 8 << 20
    target_tile_bytes = min(8 << 20, max(1 << 20, (vmem_limit - headroom) // 4))

    x2 = x.reshape(-1, F)
    M = x2.shape[0]

    # --- Lane-dense feature axis: fold g rows into the lane dim so the block's
    # last dim is a multiple of 128 (g == 1 when F already is).
    g = math.lcm(F, 128) // F
    F_eff = g * F

    # --- dtype-aware sublane multiple (8 for f32, 16 for bf16, 32 for int8).
    sub = max(8, 32 // jnp.dtype(x_dtype).itemsize)

    # --- Only pad when the row count doesn't fold evenly (<= g-1 <= 127 rows).
    # The common case (F % 128 == 0, or M % g == 0) touches no extra HBM at all.
    if M % g:
        pad_rows = g - (M % g)
        x2 = jnp.pad(x2, ((0, pad_rows), (0, 0)))
        M_pad = M + pad_rows
    else:
        M_pad = M
    M_fold = M_pad // g
    x3 = x2.reshape(M_fold, F_eff)  # free view: contiguous row-major re-interpretation

    # --- Feature tile: full (folded) feature axis unless that would force the row
    # tile below ~256 rows; then the largest 128-multiple divisor of F_eff that fits.
    min_rows = 256
    if F_eff * itemsize * min_rows <= target_tile_bytes:
        tf = F_eff
    else:
        tf = 128
        cap = max(128, (target_tile_bytes // (min_rows * itemsize)) // 128 * 128)
        for cand in range(cap, 0, -128):
            if F_eff % cand == 0:
                tf = cand
                break

    # --- Row tile: largest multiple of `sub` under the VMEM budget; rely on the
    # cdiv grid + Pallas masking for a partial trailing row block (no row padding).
    if M_fold <= sub:
        tm = M_fold                                   # block == full row extent
    else:
        budget_tm = max(sub, (target_tile_bytes // (tf * itemsize)) // sub * sub)
        tm = min(budget_tm, (M_fold // sub) * sub)    # never exceed the array

    nf = F_eff // tf
    nm = pl.cdiv(M_fold, tm)

    # --- Megacore guard (v7x has 2 TCs): avoid a degenerate 1x1 grid when splittable.
    if nf * nm == 1 and M_fold >= 2 * sub:
        tm_half = -(-((M_fold + 1) // 2) // sub) * sub
        if sub <= tm_half < M_fold:
            tm = tm_half
            nm = pl.cdiv(M_fold, tm)

    # scale/bias stay f32 so the affine math is full precision even for bf16 x.
    scale2 = jnp.tile(scale.astype(jnp.float32), g).reshape(1, F_eff)
    bias2 = jnp.tile(bias.astype(jnp.float32), g).reshape(1, F_eff)

    n_elems = M * F
    cost = pl.CostEstimate(
        flops=2 * n_elems,
        transcendentals=0,
        bytes_accessed=n_elems * (jnp.dtype(x_dtype).itemsize
                                  + jnp.dtype(out_dtype).itemsize) + 8 * F_eff,
    )

    # Feature axis first (slow) so the (1, tf) scale/bias blocks stay resident across
    # the inner row sweep; both axes "parallel" so v7x shards across its two cores.
    out = pl.pallas_call(
        _scaling_kernel,
        out_shape=jax.ShapeDtypeStruct((M_fold, F_eff), out_dtype),
        grid_spec=pltpu.PrefetchScalarGridSpec(
            num_scalar_prefetch=0,
            grid=(nf, nm),
            in_specs=[
                pl.BlockSpec((tm, tf), lambda j, i: (i, j)),
                pl.BlockSpec((1, tf), lambda j, i: (0, j)),   # resident per feature tile
                pl.BlockSpec((1, tf), lambda j, i: (0, j)),
            ],
            out_specs=pl.BlockSpec((tm, tf), lambda j, i: (i, j)),
        ),
        compiler_params=pltpu.CompilerParams(
            dimension_semantics=("parallel", "parallel"),
            vmem_limit_bytes=int(vmem_limit),
        ),
        cost_estimate=cost,
    )(x3, scale2, bias2)

    out = out.reshape(M_pad, F)
    if M_pad != M:
        out = out[:M]
    return out.reshape(orig_shape[:-1] + (F,)).astype(out_dtype)


if __name__ == "__main__":
    key = jax.random.PRNGKey(0)
    batch, seq, num_features = 2, 8, 32

    k_x, k_s, k_b, k_x2 = jax.random.split(key, 4)
    x = jax.random.normal(k_x, (batch, seq, num_features), dtype=jnp.float32)
    scale = jnp.ones((num_features,), jnp.float32) + 0.1 * jax.random.normal(
        k_s, (num_features,), dtype=jnp.float32
    )
    bias = jnp.zeros((num_features,), jnp.float32) + 0.1 * jax.random.normal(
        k_b, (num_features,), dtype=jnp.float32
    )

    y = jax.block_until_ready(learnable_scaling(x, scale, bias))
    y_ref = scale * x + bias
    assert jnp.allclose(y, y_ref, atol=1e-6), "mismatch vs reference (small shape)"

    # Ragged row count exercises the (tiny) pad-to-multiple-of-g fold path.
    x_odd = jax.random.normal(k_x2, (3, 7, num_features), dtype=jnp.float32)
    y_odd = jax.block_until_ready(learnable_scaling(x_odd, scale, bias))
    assert jnp.allclose(y_odd, scale * x_odd + bias, atol=1e-6), "mismatch (odd shape)"

    print("KERNEL_OK")
</pallas_src>

<mosaic_0001>
module attributes {stable_mosaic.version = 11 : i64} {
  func.func @_scaling_kernel(%arg0: i32, %arg1: i32, %arg2: memref<4x128xf32, #tpu.memory_space<vmem>>, %arg3: memref<1x128xf32, #tpu.memory_space<vmem>>, %arg4: memref<1x128xf32, #tpu.memory_space<vmem>>, %arg5: memref<4x128xf32, #tpu.memory_space<vmem>>) attributes {dimension_semantics = [#tpu.dimension_semantics<parallel>, #tpu.dimension_semantics<parallel>], iteration_bounds = array<i64: 1, 1>, scalar_prefetch = 0 : i64, scratch_operands = 0 : i64, tpu.core_type = #tpu.core_type<tc>, window_params = [{transform_indices = @transform_0, window_bounds = array<i64: 4, 128>}, {transform_indices = @transform_1, window_bounds = array<i64: 1, 128>}, {transform_indices = @transform_2, window_bounds = array<i64: 1, 128>}, {transform_indices = @transform_3, window_bounds = array<i64: 4, 128>}]} {
    %c0 = arith.constant 0 : index
    %c0_0 = arith.constant 0 : index
    %0 = vector.load %arg2[%c0, %c0_0] : memref<4x128xf32, #tpu.memory_space<vmem>>, vector<4x128xf32>
    %c0_1 = arith.constant 0 : index
    %c0_2 = arith.constant 0 : index
    %1 = vector.load %arg3[%c0_1, %c0_2] : memref<1x128xf32, #tpu.memory_space<vmem>>, vector<1x128xf32>
    %2 = vector.broadcast %1 : vector<1x128xf32> to vector<4x128xf32>
    %3 = arith.mulf %2, %0 : vector<4x128xf32>
    %c0_3 = arith.constant 0 : index
    %c0_4 = arith.constant 0 : index
    %4 = vector.load %arg4[%c0_3, %c0_4] : memref<1x128xf32, #tpu.memory_space<vmem>>, vector<1x128xf32>
    %5 = vector.broadcast %4 : vector<1x128xf32> to vector<4x128xf32>
    %6 = arith.addf %3, %5 : vector<4x128xf32>
    %c0_5 = arith.constant 0 : index
    %c0_6 = arith.constant 0 : index
    %7 = vector.load %arg5[%c0_5, %c0_6] : memref<4x128xf32, #tpu.memory_space<vmem>>, vector<4x128xf32>
    tpu.vector_store %arg5[%c0_5, %c0_6], %6 {strides = array<i32>} : memref<4x128xf32, #tpu.memory_space<vmem>>, vector<4x128xf32>,
    return
  }
  func.func @transform_0(%arg0: i32, %arg1: i32) -> (i32, i32) {
    %c0_i32 = arith.constant 0 : i32
    return %arg1, %arg0 : i32, i32
  }
  func.func @transform_1(%arg0: i32, %arg1: i32) -> (i32, i32) {
    %c0_i32 = arith.constant 0 : i32
    %c0_i32_0 = arith.constant 0 : i32
    return %c0_i32, %arg0 : i32, i32
  }
  func.func @transform_2(%arg0: i32, %arg1: i32) -> (i32, i32) {
    %c0_i32 = arith.constant 0 : i32
    %c0_i32_0 = arith.constant 0 : i32
    return %c0_i32, %arg0 : i32, i32
  }
  func.func @transform_3(%arg0: i32, %arg1: i32) -> (i32, i32) {
    %c0_i32 = arith.constant 0 : i32
    return %arg1, %arg0 : i32, i32
  }
}

</mosaic_0001>

<bundles_post_ra>
// kernel: tpu_custom_call.1
= control target key start
LH: loop header
LB: loop body
LE: loop exit
PB: predicated region body
PF: predicated region fallthrough
CT: control target
= control target key end

     0   :  { %8 = vsyncpa [#allocation3], 0  ;;  %s256_s0 = inlined_call_operand.hbm [shape: f32[4,128], index: 0, kind: input, shape index: {}]   ;;  %s257_s1 = inlined_call_operand.hbm [shape: f32[1,128], index: 1, kind: input, shape index: {}]   ;;  %s258_s2 = inlined_call_operand.hbm [shape: f32[1,128], index: 2, kind: input, shape index: {}]   ;;  %s259_s3 = inlined_call_operand.hbm [shape: f32[4,128], index: 3, kind: output, shape index: {}]  }
   0x1   :  { %9 = vsyncpa [#allocation6], 0 }
   0x2   :  { %10 = vsyncpa [#allocation4], 0  ;;  %s184_s12 = smov [#allocation5]   ;;  %s185_s14 = smov [#allocation2]  }
   0x3   :  { %s27_s13 = sshll.u32 %s184_s12, 4  ;;  %s17_s15 = sshll.u32 %s185_s14, 4  ;;  %s28_s13 = int_to_ptr.vmem [resolvable:$true] %s27_s13  ;;  %s18_s15 = int_to_ptr.vmem [resolvable:$true] %s17_s15 }
   0x4   :  { %s90_s18 = scalar_lea.hbm %s257_s1, 16 }
   0x5   :  { %p91_p0 = scmp.ne.s32.totalorder %s257_s1, %s90_s18  ;;  %p94_p1 = scmp.lt.u32.totalorder %s90_s18, %s257_s1 }
   0x7   :  { %p96_p2 = pnand %p94_p1, %p91_p0 }
   0x9   :  { %99 = shalt.err (!%p96_p2)
}
   0xa   :  { %s100_s23 = scalar_lea.vmem %s28_s13, 16  ;;  %s104_s24 = scalar_lea.vmem %s28_s13, 32 }
   0xb   :  { %p101_p3 = scmp.ne.s32.totalorder %s28_s13, %s100_s23  ;;  %p105_p4 = scmp.lt.s32.totalorder %s28_s13, %s28_s13 }
   0xc   :  { %p106_p5 = scmp.lt.s32.totalorder %s104_s24, %s100_s23 }
   0xe   :  { %p107_p6 = por %p106_p5, %p105_p4 }
  0x10   :  { %p108_p7 = pnand %p107_p6, %p101_p3 }
  0x12   :  { %111 = shalt.err (!%p108_p7)
}
  0x13   :  { %30 = dma.hbm_to_vmem [thread:$0]  %s257_s1, 16, %s28_s13, [#allocation6]  }
  0x14   :  { %s112_s29 = scalar_lea.hbm %s256_s0, 64 }
  0x15   :  { %p113_p8 = scmp.ne.s32.totalorder %s256_s0, %s112_s29  ;;  %p116_p9 = scmp.lt.u32.totalorder %s112_s29, %s256_s0 }
  0x17   :  { %p118_p10 = pnand %p116_p9, %p113_p8 }
  0x19   :  { %121 = shalt.err (!%p118_p10)
}
  0x1a   :  { %s122_s7 = scalar_lea.vmem %s18_s15, 64  ;;  %p127_p12 = scmp.lt.s32.totalorder %s18_s15, %s18_s15 }
  0x1b   :  { %p123_p11 = scmp.ne.s32.totalorder %s18_s15, %s122_s7  ;;  %p128_p13 = scmp.lt.s32.totalorder %s122_s7, %s122_s7 }
  0x1d   :  { %p129_p0 = por %p128_p13, %p127_p12 }
  0x1f   :  { %p130_p1 = pnand %p129_p0, %p123_p11 }
  0x21   :  { %133 = shalt.err (!%p130_p1)
}
  0x22   :  { %20 = dma.hbm_to_vmem [thread:$0]  %s256_s0, 64, %s18_s15, [#allocation3]  }
  0x23   :  { %s186_s9 = smov [#allocation7]   ;;  %s134_s13 = scalar_lea.hbm %s258_s2, 16 }
  0x24   :  { %s37_s10 = sshll.u32 %s186_s9, 4  ;;  %p135_p2 = scmp.ne.s32.totalorder %s258_s2, %s134_s13  ;;  %s38_s10 = int_to_ptr.vmem [resolvable:$true] %s37_s10 }
  0x25   :  { %p138_p3 = scmp.lt.u32.totalorder %s134_s13, %s258_s2 }
  0x27   :  { %p140_p4 = pnand %p138_p3, %p135_p2 }
  0x29   :  { %143 = shalt.err (!%p140_p4)
}
  0x2a   :  { %s144_s19 = scalar_lea.vmem %s38_s10, 16  ;;  %s148_s0 = scalar_lea.vmem %s38_s10, 32 }
  0x2b   :  { %p145_p5 = scmp.ne.s32.totalorder %s38_s10, %s144_s19  ;;  %p149_p6 = scmp.lt.s32.totalorder %s38_s10, %s38_s10 }
  0x2c   :  { %p150_p7 = scmp.lt.s32.totalorder %s148_s0, %s144_s19 }
  0x2e   :  { %p151_p8 = por %p150_p7, %p149_p6 }
  0x30   :  { %p152_p9 = pnand %p151_p8, %p145_p5 }
  0x32   :  { %155 = shalt.err (!%p152_p9)
}
  0x33   :  { %40 = dma.hbm_to_vmem [thread:$0]  %s258_s2, 16, %s38_s10, [#allocation6]  }
  0x34   :  { %178 = dma.done.wait [#allocation3], 64  }
  0x35   :  { %179 = vsyncadd [#allocation3], 4294967232 }
  0x36   :  { %180 = dma.done.wait [#allocation6], 32  }
  0x37   :  { %181 = vsyncadd [#allocation6], 4294967264  ;;  %s187_s21 = smov [#allocation8]   ;;  %v50_v0 = vld [vmem:[#allocation2] sm:$0xf] }
  0x38   :  { %s74_s22 = sshll.u32 %s187_s21, 4  ;;  %v84_v1 = vld [vmem:[#allocation5] ss:$0 sm:$0xff]  ;;  %v85_v2 = vld [vmem:[#allocation7] ss:$0 sm:$0xff]  ;;  %s75_s22 = int_to_ptr.vmem [resolvable:$true] %s74_s22 }
  0x39   :  { %v58_v3 = vmul.f32 %v84_v1, %v50_v0  ;;  %s156_s23 = scalar_lea.vmem %s75_s22, 64  ;;  %p161_p11 = scmp.lt.s32.totalorder %s75_s22, %s75_s22 }
  0x3a   :  { %p157_p10 = scmp.ne.s32.totalorder %s75_s22, %s156_s23  ;;  %p162_p12 = scmp.lt.s32.totalorder %s156_s23, %s156_s23 }
  0x3b   :  { %v66_v4 = vadd.f32 %v85_v2, %v58_v3 }
  0x3c   :  { %p163_p13 = por %p162_p12, %p161_p11 }
  0x3d   :  { %67 = vst [vmem:[#allocation8] sm:$0xf] %v66_v4 }
  0x3e   :  { %p164_p0 = pnand %p163_p13, %p157_p10 }
  0x40   :  { %167 = shalt.err (!%p164_p0)
}
  0x41   :  { %s168_s25 = scalar_lea.hbm %s259_s3, 64 }
  0x42   :  { %p169_p1 = scmp.ne.s32.totalorder %s259_s3, %s168_s25  ;;  %p172_p2 = scmp.lt.u32.totalorder %s168_s25, %s259_s3 }
  0x44   :  { %p174_p3 = pnand %p172_p2, %p169_p1 }
  0x46   :  { %177 = shalt.err (!%p174_p3)
}
  0x47   :  { %77 = dma.vmem_to_hbm [thread:$0]  %s75_s22, 64, %s259_s3, [#allocation4]  }
  0x48   :  { %182 = dma.done.wait [#allocation4], 64  }
  0x49   :  { %183 = vsyncadd [#allocation4], 4294967232 }
  0x4a   :  { %81 = vsyncpa [#allocation3], 1 }
  0x4b   :  { %82 = vsyncpa [#allocation6], 1 }
  0x4c   :  { %83 = vsyncpa [#allocation4], 1 }

</bundles_post_ra>
